<compile_context>
chip_gen: v5e
topology: v5e:2x2
jax: 0.10.0
libtpu: 0.0.40
codegen_flags: <defaults>
</compile_context>

<pallas_src>
import jax
import jax.numpy as jnp
from jax.experimental import pallas as pl
from jax.experimental.pallas import tpu as pltpu

# ~1 MiB per block/buffer: captures ~85%+ of HBM roofline while keeping the
# double-buffered VMEM footprint (<= ~8 MiB total) safe on v5e/v6e/v7x defaults.
_TARGET_BLOCK_BYTES = 1 << 20


def _merge_add_kernel(x_ref, s_ref, o_ref):
    o_ref[...] = x_ref[...] + s_ref[...]


def _merge_cat_kernel(x_ref, s_ref, o_ref):
    # o_ref block: (N, 2, T). Writing half 0 <- x and half 1 <- shortcut is
    # exactly channel-dim concatenation once the contiguous (N, 2, C*H*W)
    # output is reshaped to (N, 2C, H, W).
    o_ref[:, 0, :] = x_ref[...]
    o_ref[:, 1, :] = s_ref[...]


def _pick_flat_2d(n, natural_last):
    """Pick a pad-free, lane-dense 2D view (rows, W) of a flat length-n array."""
    for w in (4096, 2048, 1024, 512, 256, 128):
        if n % w == 0:
            return n // w, w
    # Ragged total: fall back to the natural trailing dim (a full-extent last
    # dim always satisfies the (8,128) block rule).
    w = natural_last if natural_last > 0 and n % natural_last == 0 else n
    return n // w, w


def _merge_add(x, shortcut):
    assert x.shape == shortcut.shape and x.dtype == shortcut.dtype
    n = x.size
    itemsize = jnp.dtype(x.dtype).itemsize
    natural_last = x.shape[-1] if x.ndim > 1 else n
    rows, w = _pick_flat_2d(n, natural_last)
    x2 = x.reshape(rows, w)
    s2 = shortcut.reshape(rows, w)

    row_bytes = w * itemsize
    target_rows = max(8, (_TARGET_BLOCK_BYTES // row_bytes) // 8 * 8)
    block_rows = rows if rows <= target_rows else target_rows  # full dim or multiple of 8

    grid = (pl.cdiv(rows, block_rows),)
    out = pl.pallas_call(
        _merge_add_kernel,
        out_shape=jax.ShapeDtypeStruct((rows, w), x.dtype),
        grid=grid,
        in_specs=[
            pl.BlockSpec((block_rows, w), lambda i: (i, 0)),
            pl.BlockSpec((block_rows, w), lambda i: (i, 0)),
        ],
        out_specs=pl.BlockSpec((block_rows, w), lambda i: (i, 0)),
        compiler_params=pltpu.CompilerParams(dimension_semantics=("parallel",)),
    )(x2, s2)
    return out.reshape(x.shape)


def _merge_cat(x, shortcut):
    if x.shape != shortcut.shape:
        # TODO(synk): dense merge with mismatched channel counts has no clean
        # single-pass Pallas tiling here; fall back to XLA concatenate.
        return jnp.concatenate([x, shortcut], axis=1)

    n_batch = x.shape[0]
    chw = x.size // n_batch
    itemsize = jnp.dtype(x.dtype).itemsize
    x2 = x.reshape(n_batch, chw)
    s2 = shortcut.reshape(n_batch, chw)

    if chw % 128 == 0:
        t_target = max(128, (_TARGET_BLOCK_BYTES // (n_batch * itemsize)) // 128 * 128)
        t = min(chw, t_target)
    else:
        t = chw  # full-extent last dim is always a legal block width

    grid = (pl.cdiv(chw, t),)
    out = pl.pallas_call(
        _merge_cat_kernel,
        out_shape=jax.ShapeDtypeStruct((n_batch, 2, chw), x.dtype),
        grid=grid,
        in_specs=[
            pl.BlockSpec((n_batch, t), lambda j: (0, j)),
            pl.BlockSpec((n_batch, t), lambda j: (0, j)),
        ],
        out_specs=pl.BlockSpec((n_batch, 2, t), lambda j: (0, 0, j)),
        compiler_params=pltpu.CompilerParams(dimension_semantics=("parallel",)),
    )(x2, s2)

    # (N, 2, C*H*W) is bit-identical (contiguous) to cat([x, shortcut], dim=1).
    out_shape = (n_batch, 2 * x.shape[1]) + tuple(x.shape[2:])
    return out.reshape(out_shape)


def merge_layer(x, orig, dense=False):
    return _merge_cat(x, orig) if dense else _merge_add(x, orig)


class MergeLayer:
    """Pallas-backed equivalent of fastai's MergeLayer (shortcut passed explicitly)."""

    def __init__(self, dense=False):
        self.dense = dense

    def __call__(self, x, orig):
        return merge_layer(x, orig, dense=self.dense)


if __name__ == "__main__":
    key = jax.random.PRNGKey(0)
    k1, k2 = jax.random.split(key)
    x = jax.random.normal(k1, (2, 4, 16, 16), dtype=jnp.float32)
    orig = jax.random.normal(k2, (2, 4, 16, 16), dtype=jnp.float32)

    # dense=False: residual add
    y_add = MergeLayer(dense=False)(x, orig)
    jax.block_until_ready(y_add)
    assert y_add.shape == x.shape and y_add.dtype == x.dtype
    assert jnp.allclose(y_add, x + orig, atol=1e-6, rtol=1e-6)

    # dense=True: channel concatenation
    y_cat = MergeLayer(dense=True)(x, orig)
    jax.block_until_ready(y_cat)
    ref_cat = jnp.concatenate([x, orig], axis=1)
    assert y_cat.shape == ref_cat.shape and y_cat.dtype == x.dtype
    assert jnp.allclose(y_cat, ref_cat, atol=1e-6, rtol=1e-6)

    print("KERNEL_OK")
</pallas_src>

<mosaic_0001>
module attributes {stable_mosaic.version = 11 : i64} {
  func.func @_merge_add_kernel(%arg0: i32, %arg1: memref<1x2048xf32, #tpu.memory_space<vmem>>, %arg2: memref<1x2048xf32, #tpu.memory_space<vmem>>, %arg3: memref<1x2048xf32, #tpu.memory_space<vmem>>) attributes {dimension_semantics = [#tpu.dimension_semantics<parallel>], iteration_bounds = array<i64: 1>, scalar_prefetch = 0 : i64, scratch_operands = 0 : i64, tpu.core_type = #tpu.core_type<tc>, window_params = [{transform_indices = @transform_0, window_bounds = array<i64: 1, 2048>}, {transform_indices = @transform_1, window_bounds = array<i64: 1, 2048>}, {transform_indices = @transform_2, window_bounds = array<i64: 1, 2048>}]} {
    %c0 = arith.constant 0 : index
    %c0_0 = arith.constant 0 : index
    %0 = vector.load %arg1[%c0, %c0_0] : memref<1x2048xf32, #tpu.memory_space<vmem>>, vector<1x2048xf32>
    %c0_1 = arith.constant 0 : index
    %c0_2 = arith.constant 0 : index
    %1 = vector.load %arg2[%c0_1, %c0_2] : memref<1x2048xf32, #tpu.memory_space<vmem>>, vector<1x2048xf32>
    %2 = arith.addf %0, %1 : vector<1x2048xf32>
    %c0_3 = arith.constant 0 : index
    %c0_4 = arith.constant 0 : index
    %3 = vector.load %arg3[%c0_3, %c0_4] : memref<1x2048xf32, #tpu.memory_space<vmem>>, vector<1x2048xf32>
    tpu.vector_store %arg3[%c0_3, %c0_4], %2 {strides = array<i32>} : memref<1x2048xf32, #tpu.memory_space<vmem>>, vector<1x2048xf32>,
    return
  }
  func.func @transform_0(%arg0: i32) -> (i32, i32) {
    %c0_i32 = arith.constant 0 : i32
    %c0_i32_0 = arith.constant 0 : i32
    return %arg0, %c0_i32 : i32, i32
  }
  func.func @transform_1(%arg0: i32) -> (i32, i32) {
    %c0_i32 = arith.constant 0 : i32
    %c0_i32_0 = arith.constant 0 : i32
    return %arg0, %c0_i32 : i32, i32
  }
  func.func @transform_2(%arg0: i32) -> (i32, i32) {
    %c0_i32 = arith.constant 0 : i32
    %c0_i32_0 = arith.constant 0 : i32
    return %arg0, %c0_i32 : i32, i32
  }
}

</mosaic_0001>

<bundles_post_ra>
// kernel: tpu_custom_call.1
= control target key start
LH: loop header
LB: loop body
LE: loop exit
PB: predicated region body
PF: predicated region fallthrough
CT: control target
= control target key end

     0   :  { %7 = vsyncpa [#allocation3], 0  ;;  %s174_s0 = inlined_call_operand.hbm [shape: f32[1,2048], index: 0, kind: input, shape index: {}]   ;;  %s175_s1 = inlined_call_operand.hbm [shape: f32[1,2048], index: 1, kind: input, shape index: {}]   ;;  %s176_s2 = inlined_call_operand.hbm [shape: f32[1,2048], index: 2, kind: output, shape index: {}]  }
   0x1   :  { %8 = vsyncpa [#allocation6], 0 }
   0x2   :  { %9 = vsyncpa [#allocation4], 0  ;;  %s15_s11 = sshll.u32 %s174_s0, 4  ;;  %s147_s12 = smov [#allocation2]   ;;  %s16_s11 = int_to_ptr.hbm [resolvable:$true] %s15_s11 }
   0x3   :  { %s17_s13 = sshll.u32 %s147_s12, 4  ;;  %s26_s16 = sshll.u32 %s175_s1, 4  ;;  %s18_s13 = int_to_ptr.vmem [resolvable:$true] %s17_s13  ;;  %s27_s16 = int_to_ptr.hbm [resolvable:$true] %s26_s16 }
   0x4   :  { %20 = dma.hbm_to_vmem [thread:$0]  %s16_s11, 256, %s18_s13, [#allocation3]  }
   0x5   :  { %s148_s17 = smov [#allocation5]  }
   0x6   :  { %s28_s18 = sshll.u32 %s148_s17, 4  ;;  %s29_s18 = int_to_ptr.vmem [resolvable:$true] %s28_s18 }
   0x7   :  { %31 = dma.hbm_to_vmem [thread:$0]  %s27_s16, 256, %s29_s18, [#allocation6]  }
   0x8   :  { %141 = dma.done.wait [#allocation3], 256  }
   0x9   :  { %142 = vsyncadd [#allocation3], 4294967040 }
   0xa   :  { %143 = dma.done.wait [#allocation6], 256  }
   0xb   :  { %144 = vsyncadd [#allocation6], 4294967040  ;;  %s149_s19 = smov [#allocation7]   ;;  %s55_s22 = sshll.u32 %s176_s2, 4  ;;  %v40_v0 = vld [vmem:[#allocation2] sm:$0xff]  ;;  %v42_v1 = vld [vmem:[#allocation5] sm:$0xff]  ;;  %s56_s22 = int_to_ptr.hbm [resolvable:$true] %s55_s22 }
   0xc   :  { %s53_s0 = sshll.u32 %s149_s19, 4  ;;  %v41_v2 = vld [vmem:[#allocation2 + $0x8] sm:$0xff]  ;;  %v44_v3 = vadd.f32 %v42_v1, %v40_v0  ;;  %v43_v4 = vld [vmem:[#allocation5 + $0x8] sm:$0xff]  ;;  %s54_s0 = int_to_ptr.vmem [resolvable:$true] %s53_s0 }
   0xd   :  { %v45_v5 = vadd.f32 %v43_v4, %v41_v2 }
   0xe   :  { %46 = vst [vmem:[#allocation7] sm:$0xff] %v44_v3 }
   0xf   :  { %47 = vst [vmem:[#allocation7 + $0x8] sm:$0xff] %v45_v5 }
  0x10   :  { %58 = dma.vmem_to_hbm [thread:$0]  %s54_s0, 256, %s56_s22, [#allocation4]  }
  0x11   :  { %145 = dma.done.wait [#allocation4], 256  }
  0x12   :  { %146 = vsyncadd [#allocation4], 4294967040 }
  0x13   :  { %63 = vsyncpa [#allocation3], 1 }
  0x14   :  { %64 = vsyncpa [#allocation6], 1 }
  0x15   :  { %65 = vsyncpa [#allocation4], 1 }

</bundles_post_ra>
